<compile_context>
chip_gen: v7x
topology: tpu7x:2x2x1
jax: 0.10.0
libtpu: 0.0.40
codegen_flags: <defaults>
</compile_context>

<pallas_src>
import jax
import jax.numpy as jnp
from jax.experimental import pallas as pl
from jax.experimental.pallas import tpu as pltpu


def _downsample1d_kernel(t0_ref, t1_ref, t2_ref, w_ref, b_ref, o_ref):
    # t*_ref: (1, C, TL)  stride-2 conv phases for one batch / one L_out tile
    # w_ref:  (3, C_out, C_in)  conv weight, tap-major
    # b_ref:  (C_out, 1)
    # o_ref:  (1, C_out, TL)
    acc = jnp.dot(w_ref[0], t0_ref[0], preferred_element_type=jnp.float32)
    acc = acc + b_ref[...]  # bias folded into the first-tap accumulator
    acc = acc + jnp.dot(w_ref[1], t1_ref[0], preferred_element_type=jnp.float32)
    acc = acc + jnp.dot(w_ref[2], t2_ref[0], preferred_element_type=jnp.float32)
    o_ref[0] = acc.astype(o_ref.dtype)


def _choose_tile_l(l_out, c, itemsize):
    """Pick the L_out tile width (lane axis of the output block)."""
    if l_out <= 512:
        # Single tile: block dims equal the full array dims, always legal.
        return l_out
    # Budget ~8 MiB for (3 input taps + 1 output) blocks, double-buffered,
    # leaving headroom under the default scoped VMEM limit on all generations
    # (16 MiB v5e, 32 MiB v6e/v7x; v7x physical VMEM is only 64 MiB).
    budget = 8 * 1024 * 1024
    bytes_per_col = 4 * c * itemsize * 2  # (3 in + 1 out) * double-buffer
    tl = budget // max(bytes_per_col, 1)
    tl = max(128, (tl // 128) * 128)
    tl = min(tl, ((l_out + 127) // 128) * 128, 2048)
    return int(tl)


def _right_pad_last(a, n):
    d = n - a.shape[-1]
    if d == 0:
        return a
    return jnp.pad(a, ((0, 0), (0, 0), (0, d)))


def downsample1d(x, weight, bias, compute_dtype=None):
    """Conv1d(dim, dim, kernel=3, stride=2, padding=1) forward.

    Args:
      x:      (B, C, L)   NCL, like PyTorch
      weight: (C, C, 3)   (out_channels, in_channels, kernel)
      bias:   (C,)
      compute_dtype: optional dtype (e.g. jnp.bfloat16) for the MXU operands.
    Returns:
      (B, C, L_out) with L_out = floor((L + 2 - 3)/2) + 1
    """
    B, C, L = x.shape
    K, stride, pad = 3, 2, 1
    L_out = (L + 2 * pad - K) // stride + 1

    TL = _choose_tile_l(L_out, C, jnp.dtype(x.dtype).itemsize)
    Lp = ((L_out + TL - 1) // TL) * TL
    num_l_tiles = Lp // TL

    # --- stride-2 phase decomposition (strided slices; no transpose/im2col) ---
    # out[b,co,t] = bias[co] + sum_k W_k[co,:] @ x_pad[b,:,2t+k]
    x_even = x[:, :, 0::2]  # (B, C, L_out)      -> tap 1 : x_pad[2t+1] = x[2t]
    x_odd = x[:, :, 1::2]   # (B, C, L//2)
    tap1 = _right_pad_last(x_even, Lp)
    tap0 = _right_pad_last(                       # tap 0 : x_pad[2t]  = [0, x_odd]
        jnp.pad(x_odd, ((0, 0), (0, 0), (1, 0)))[:, :, :Lp], Lp)
    tap2 = _right_pad_last(x_odd, Lp)             # tap 2 : x_pad[2t+2] = x_odd, 0-tail

    # weight (C_out, C_in, K) -> (K, C_out, C_in); bias -> (C, 1)
    w_mat = jnp.transpose(weight, (2, 0, 1))
    b_mat = bias.reshape(C, 1)

    if compute_dtype is not None:  # e.g. bf16 MXU operands on v6e / v7x
        tap0, tap1, tap2 = (t.astype(compute_dtype) for t in (tap0, tap1, tap2))
        w_mat = w_mat.astype(compute_dtype)

    tap_spec = pl.BlockSpec((1, C, TL), lambda b, i: (b, 0, i))

    out_p = pl.pallas_call(
        _downsample1d_kernel,
        out_shape=jax.ShapeDtypeStruct((B, C, Lp), x.dtype),
        grid_spec=pltpu.PrefetchScalarGridSpec(
            num_scalar_prefetch=0,
            grid=(B, num_l_tiles),
            in_specs=[
                tap_spec, tap_spec, tap_spec,
                pl.BlockSpec((K, C, C), lambda b, i: (0, 0, 0)),  # resident weight
                pl.BlockSpec((C, 1), lambda b, i: (0, 0)),        # resident bias
            ],
            out_specs=pl.BlockSpec((1, C, TL), lambda b, i: (b, 0, i)),
        ),
        compiler_params=pltpu.CompilerParams(
            dimension_semantics=("parallel", "parallel")),
    )(tap0, tap1, tap2, w_mat, b_mat)

    if Lp != L_out:
        out_p = out_p[:, :, :L_out]
    return out_p


def _reference(x, weight, bias):
    return jax.lax.conv_general_dilated(
        x, weight, window_strides=(2,), padding=((1, 1),),
        dimension_numbers=("NCH", "OIH", "NCH"),
    ) + bias[None, :, None]


if __name__ == "__main__":
    key = jax.random.PRNGKey(0)

    # Primary check: small shapes consistent with the module (B=2, dim=4, L=16).
    B, C, L, K = 2, 4, 16, 3
    kx, kw, kb = jax.random.split(key, 3)
    bound = 1.0 / jnp.sqrt(jnp.float32(C * K))
    weight = jax.random.uniform(kw, (C, C, K), jnp.float32, -bound, bound)
    bias = jax.random.uniform(kb, (C,), jnp.float32, -bound, bound)
    x = jax.random.normal(kx, (B, C, L), jnp.float32)

    out = downsample1d(x, weight, bias)
    out = jax.block_until_ready(out)
    L_out = (L + 2 * 1 - 3) // 2 + 1
    assert out.shape == (B, C, L_out)
    assert jnp.allclose(out, _reference(x, weight, bias), atol=1e-5, rtol=1e-5)

    # Secondary check: odd length exercises the zero-pad tail of tap 2.
    B2, C2, L2 = 3, 8, 15
    kx2, kw2, kb2 = jax.random.split(jax.random.PRNGKey(1), 3)
    bound2 = 1.0 / jnp.sqrt(jnp.float32(C2 * K))
    w2 = jax.random.uniform(kw2, (C2, C2, K), jnp.float32, -bound2, bound2)
    b2 = jax.random.uniform(kb2, (C2,), jnp.float32, -bound2, bound2)
    x2 = jax.random.normal(kx2, (B2, C2, L2), jnp.float32)
    out2 = jax.block_until_ready(downsample1d(x2, w2, b2))
    assert out2.shape == (B2, C2, (L2 + 2 * 1 - 3) // 2 + 1)
    assert jnp.allclose(out2, _reference(x2, w2, b2), atol=1e-5, rtol=1e-5)

    print("KERNEL_OK")
</pallas_src>

<mosaic_0001>
module attributes {stable_mosaic.version = 11 : i64} {
  func.func @_downsample1d_kernel(%arg0: i32, %arg1: i32, %arg2: memref<1x4x8xf32, #tpu.memory_space<vmem>>, %arg3: memref<1x4x8xf32, #tpu.memory_space<vmem>>, %arg4: memref<1x4x8xf32, #tpu.memory_space<vmem>>, %arg5: memref<3x4x4xf32, #tpu.memory_space<vmem>>, %arg6: memref<4x1xf32, #tpu.memory_space<vmem>>, %arg7: memref<1x4x8xf32, #tpu.memory_space<vmem>>) attributes {dimension_semantics = [#tpu.dimension_semantics<parallel>, #tpu.dimension_semantics<parallel>], iteration_bounds = array<i64: 2, 1>, scalar_prefetch = 0 : i64, scratch_operands = 0 : i64, tpu.core_type = #tpu.core_type<tc>, window_params = [{transform_indices = @transform_0, window_bounds = array<i64: 1, 4, 8>}, {transform_indices = @transform_1, window_bounds = array<i64: 1, 4, 8>}, {transform_indices = @transform_2, window_bounds = array<i64: 1, 4, 8>}, {pipeline_mode = #tpu.pipeline_mode<synchronous>, transform_indices = @transform_3, window_bounds = array<i64: 3, 4, 4>}, {pipeline_mode = #tpu.pipeline_mode<synchronous>, transform_indices = @transform_4, window_bounds = array<i64: 4, 1>}, {transform_indices = @transform_5, window_bounds = array<i64: 1, 4, 8>}]} {
    %c0 = arith.constant 0 : index
    %c0_0 = arith.constant 0 : index
    %c0_1 = arith.constant 0 : index
    %0 = vector.load %arg5[%c0, %c0_0, %c0_1] : memref<3x4x4xf32, #tpu.memory_space<vmem>>, vector<1x4x4xf32>
    %1 = vector.shape_cast %0 : vector<1x4x4xf32> to vector<4x4xf32>
    %c0_2 = arith.constant 0 : index
    %c0_3 = arith.constant 0 : index
    %c0_4 = arith.constant 0 : index
    %2 = vector.load %arg2[%c0_2, %c0_3, %c0_4] : memref<1x4x8xf32, #tpu.memory_space<vmem>>, vector<1x4x8xf32>
    %3 = vector.shape_cast %2 : vector<1x4x8xf32> to vector<4x8xf32>
    %cst = arith.constant dense<0.000000e+00> : vector<4x8xf32>
    %4 = tpu.matmul %1, %3, %cst {dimension_numbers = #tpu.dot_dimension_numbers<[1], [0], [0], [1], [0, 0, 1, 1], [], []>} : vector<4x4xf32>, vector<4x8xf32>, vector<4x8xf32> -> vector<4x8xf32>
    %c0_5 = arith.constant 0 : index
    %c0_6 = arith.constant 0 : index
    %5 = vector.load %arg6[%c0_5, %c0_6] : memref<4x1xf32, #tpu.memory_space<vmem>>, vector<4x1xf32>
    %6 = vector.broadcast %5 : vector<4x1xf32> to vector<4x8xf32>
    %7 = arith.addf %4, %6 : vector<4x8xf32>
    %c1 = arith.constant 1 : index
    %c0_7 = arith.constant 0 : index
    %c0_8 = arith.constant 0 : index
    %8 = vector.load %arg5[%c1, %c0_7, %c0_8] : memref<3x4x4xf32, #tpu.memory_space<vmem>>, vector<1x4x4xf32>
    %9 = vector.shape_cast %8 : vector<1x4x4xf32> to vector<4x4xf32>
    %c0_9 = arith.constant 0 : index
    %c0_10 = arith.constant 0 : index
    %c0_11 = arith.constant 0 : index
    %10 = vector.load %arg3[%c0_9, %c0_10, %c0_11] : memref<1x4x8xf32, #tpu.memory_space<vmem>>, vector<1x4x8xf32>
    %11 = vector.shape_cast %10 : vector<1x4x8xf32> to vector<4x8xf32>
    %cst_12 = arith.constant dense<0.000000e+00> : vector<4x8xf32>
    %12 = tpu.matmul %9, %11, %cst_12 {dimension_numbers = #tpu.dot_dimension_numbers<[1], [0], [0], [1], [0, 0, 1, 1], [], []>} : vector<4x4xf32>, vector<4x8xf32>, vector<4x8xf32> -> vector<4x8xf32>
    %13 = arith.addf %7, %12 : vector<4x8xf32>
    %c2 = arith.constant 2 : index
    %c0_13 = arith.constant 0 : index
    %c0_14 = arith.constant 0 : index
    %14 = vector.load %arg5[%c2, %c0_13, %c0_14] : memref<3x4x4xf32, #tpu.memory_space<vmem>>, vector<1x4x4xf32>
    %15 = vector.shape_cast %14 : vector<1x4x4xf32> to vector<4x4xf32>
    %c0_15 = arith.constant 0 : index
    %c0_16 = arith.constant 0 : index
    %c0_17 = arith.constant 0 : index
    %16 = vector.load %arg4[%c0_15, %c0_16, %c0_17] : memref<1x4x8xf32, #tpu.memory_space<vmem>>, vector<1x4x8xf32>
    %17 = vector.shape_cast %16 : vector<1x4x8xf32> to vector<4x8xf32>
    %cst_18 = arith.constant dense<0.000000e+00> : vector<4x8xf32>
    %18 = tpu.matmul %15, %17, %cst_18 {dimension_numbers = #tpu.dot_dimension_numbers<[1], [0], [0], [1], [0, 0, 1, 1], [], []>} : vector<4x4xf32>, vector<4x8xf32>, vector<4x8xf32> -> vector<4x8xf32>
    %19 = arith.addf %13, %18 : vector<4x8xf32>
    %c0_19 = arith.constant 0 : index
    %c0_20 = arith.constant 0 : index
    %c0_21 = arith.constant 0 : index
    %20 = vector.load %arg7[%c0_19, %c0_20, %c0_21] : memref<1x4x8xf32, #tpu.memory_space<vmem>>, vector<1x4x8xf32>
    %21 = vector.shape_cast %20 : vector<1x4x8xf32> to vector<4x8xf32>
    %22 = vector.shape_cast %19 : vector<4x8xf32> to vector<1x4x8xf32>
    tpu.vector_store %arg7[%c0_19, %c0_20, %c0_21], %22 {strides = array<i32>} : memref<1x4x8xf32, #tpu.memory_space<vmem>>, vector<1x4x8xf32>,
    return
  }
  func.func @transform_0(%arg0: i32, %arg1: i32) -> (i32, i32, i32) {
    %c0_i32 = arith.constant 0 : i32
    %c0_i32_0 = arith.constant 0 : i32
    return %arg0, %c0_i32, %arg1 : i32, i32, i32
  }
  func.func @transform_1(%arg0: i32, %arg1: i32) -> (i32, i32, i32) {
    %c0_i32 = arith.constant 0 : i32
    %c0_i32_0 = arith.constant 0 : i32
    return %arg0, %c0_i32, %arg1 : i32, i32, i32
  }
  func.func @transform_2(%arg0: i32, %arg1: i32) -> (i32, i32, i32) {
    %c0_i32 = arith.constant 0 : i32
    %c0_i32_0 = arith.constant 0 : i32
    return %arg0, %c0_i32, %arg1 : i32, i32, i32
  }
  func.func @transform_3(%arg0: i32, %arg1: i32) -> (i32, i32, i32) {
    %c0_i32 = arith.constant 0 : i32
    %c0_i32_0 = arith.constant 0 : i32
    %c0_i32_1 = arith.constant 0 : i32
    %c0_i32_2 = arith.constant 0 : i32
    return %c0_i32, %c0_i32_0, %c0_i32_1 : i32, i32, i32
  }
  func.func @transform_4(%arg0: i32, %arg1: i32) -> (i32, i32) {
    %c0_i32 = arith.constant 0 : i32
    %c0_i32_0 = arith.constant 0 : i32
    %c0_i32_1 = arith.constant 0 : i32
    return %c0_i32, %c0_i32_0 : i32, i32
  }
  func.func @transform_5(%arg0: i32, %arg1: i32) -> (i32, i32, i32) {
    %c0_i32 = arith.constant 0 : i32
    %c0_i32_0 = arith.constant 0 : i32
    return %arg0, %c0_i32, %arg1 : i32, i32, i32
  }
}

</mosaic_0001>

<bundles_post_ra>
// kernel: tpu_custom_call.1
= control target key start
LH: loop header
LB: loop body
LE: loop exit
PB: predicated region body
PF: predicated region fallthrough
CT: control target
= control target key end

     0   :  { %s1347_s0 = inlined_call_operand.hbm [shape: f32[2,4,8], index: 0, kind: input, shape index: {}]   ;;  %s1348_s1 = inlined_call_operand.hbm [shape: f32[2,4,8], index: 1, kind: input, shape index: {}]   ;;  %s1349_s2 = inlined_call_operand.hbm [shape: f32[2,4,8], index: 2, kind: input, shape index: {}]   ;;  %s1350_s3 = inlined_call_operand.vmem [shape: f32[3,4,4], index: 3, kind: input, shape index: {}]   ;;  %s1351_s4 = inlined_call_operand.vmem [shape: f32[4,1], index: 4, kind: input, shape index: {}]   ;;  %s1352_s5 = inlined_call_operand.hbm [shape: f32[2,4,8], index: 5, kind: output, shape index: {}]  }
   0x1   :  { %1362 = sst [smem:[#allocation17_spill]] %s1348_s1 }
   0x2   :  { %10 = vsyncpa [#allocation3], 0 }
   0x3   :  { %12 = vsyncpa [#allocation3 + $0x1], 0 }
   0x4   :  { %13 = vsyncpa [#allocation6], 0 }
   0x5   :  { %15 = vsyncpa [#allocation6 + $0x1], 0 }
   0x6   :  { %16 = vsyncpa [#allocation4], 0 }
   0x7   :  { %18 = vsyncpa [#allocation4 + $0x1], 0  ;;  %s1065_s18 = smov 0   ;;  %s1067_s19 = smov 0  }
   0x8   :  { %s1069_s20 = smov 0   ;;  %s1071_s21 = smov 0  }
   0x9   :  { %s1073_s22 = smov 0   ;;  %s1075_s23 = smov 0  }
   0xa LB: > { %1363 = sst [smem:[#allocation12_spill]] %s1022_s22  ;;  %s1096_s24 = sadd.s32 4294967295, %s1026_s23   ;;  %s1026_s23 = sphi %s1075_s23, %s24_s23   ;;  %s1022_s22 = sphi %s1073_s22, %s1389_s22   ;;  %s1018_s21 = sphi %s1071_s21, %s1388_s21   ;;  %s1014_s20 = sphi %s1069_s20, %s1392_s20   ;;  %s1010_s19 = sphi %s1067_s19, %s1391_s19   ;;  %s1006_s18 = sphi %s1065_s18, %s1390_s18  }
   0xb   : > { %1364 = sst [smem:[#allocation13_spill]] %s1026_s23  ;;  %s723_s25 = sadd.s32 4294967294, %s1026_s23  }
   0xc   : > { %s36_s26 = sadd.s32 1, %s1022_s22  ;;  %s45_s27 = sadd.s32 1, %s1014_s20 }
   0xd   : > { %p38_p0 = scmp.ge.s32.totalorder %s36_s26, 2  ;;  %p52_p1 = scmp.ne.s32.totalorder %s1014_s20, %s1010_s19 }
   0xe   : > { %p53_p2 = scmp.eq.s32.totalorder %s1026_s23, 0  ;;  %p58_p3 = scmp.ne.s32.totalorder %s1010_s19, %s1006_s18 }
   0xf   : > { %s1394_s26 = smov (%p38_p0, %s36_s26), 0  ;;  %p59_p5 = scmp.eq.s32.totalorder %s1096_s24, 0 }
  0x10   : > { %1365 = sst [smem:[#allocation14_spill]] %s1394_s26  ;;  %p1108_p4 = por %p53_p2, %p52_p1 }
  0x11   : > { %s40_s29 = ssub.s32 %s1022_s22, %s1394_s26  ;;  %p182_p6 = scmp.eq.s32.totalorder %s1096_s24, 1 }
  0x12   : > { %p43_p7 = scmp.eq.s32.totalorder %s40_s29, 0  ;;  %p1116_p8 = por %p59_p5, %p58_p3 }
  0x13   : > { %p1120_p9 = por %p182_p6, %p52_p1  ;;  %p188_p10 = scmp.eq.s32.totalorder %s723_s25, 1 }
  0x14   : > { %s1367_s30 = scalar_select %p1116_p8, 1, 0 }
  0x15   : > { %s1368_s6 = scalar_select %p1120_p9, 1, 0 }
  0x16   : > { %s1125_s7 = scalar_select %p43_p7, %s1014_s20, %s45_s27  }
  0x17   : > { %p1127_p11 = por %p188_p10, %p58_p3  ;;  %p796_p13 = scmp.lt.s32.totalorder %s1026_s23, 2 }
  0x18   : > { %1369 = sst [smem:[#allocation15_spill]] %s1125_s7  ;;  %s1353_s9 = sand.u32 1, %s1014_s20  }
  0x19   : > { %s1370_s8 = scalar_select %p1127_p11, 1, 0 }
  0x1a   : > { %s1136_s10 = sshll.u32 %s1353_s9, 2  ;;  %s1139_s11 = sshll.u32 %s1022_s22, 6 }
  0x1b   : > { %1371 = sst [smem:[#allocation16_spill]] %s1370_s8  ;;  %p1143_p0 = pnand %p796_p13, %p1108_p4 }
  0x1c   : > { %s233_s13 = sand.u32 1, %s1026_s23   ;;  %s1373_s1 = sld [smem:[#allocation17_spill]] }
  0x1d   : > { %s1372_s12 = scalar_select %p1143_p0, 1, 0 }
  0x1e   : > { %s237_s17 = scalar_lea.vmem [#allocation5], %s1136_s10  ;;  %s1159_s27 = scalar_lea.sflag [#allocation6], %s233_s13 }
  0x1f   : > { %s245_s25 = sshll.u32 %s237_s17, 4  ;;  %p1165_p4 = pneg %p1143_p0  ;;  %s1156_s25 = int_to_ptr.vmem [resolvable:$true] %s245_s25 }
  0x22   : > { %s1152_s16 = scalar_lea.hbm %s1373_s1, %s1139_s11  ;;  %s855_s17 = scalar_lea.hbm %s1373_s1, 128 }
  0x23   : > { %s850_s28 = scalar_lea.hbm %s1152_s16, 64  ;;  %p856_p7 = scmp.lt.u32.totalorder %s1152_s16, %s1373_s1 }
  0x24   : > { %p851_p3 = scmp.ne.s32.totalorder %s1152_s16, %s850_s28  ;;  %p857_p10 = scmp.lt.u32.totalorder %s855_s17, %s850_s28 }
  0x25   : > { %p859_p12 = scmp.lt.u32.totalorder %s850_s28, %s1152_s16 }
  0x26   : > { %p853_p5 = pnand %p1165_p4, %p851_p3  ;;  %p858_p13 = por %p857_p10, %p856_p7 }
  0x28   : > { %p854_p6 = pneg %p853_p5  ;;  %p860_p1 = por %p859_p12, %p858_p13 }
  0x2a   : > { %p861_p2 = pnand %p860_p1, %p854_p6 }
  0x2c   : > { %864 = shalt.err (!%p861_p2)
}
  0x2d   : > { %s865_s13 = scalar_lea.vmem %s1156_s25, 64  ;;  %s1028_s14 = smov [#allocation5]  }
  0x2e   : > { %p866_p3 = scmp.ne.s32.totalorder %s1156_s25, %s865_s13  ;;  %s870_s15 = sshll.u32 %s1028_s14, 4  ;;  %s871_s15 = int_to_ptr.vmem [resolvable:$false] %s870_s15 }
  0x2f   : > { %s872_s26 = scalar_lea.vmem %s871_s15, 128  ;;  %p873_p9 = scmp.lt.s32.totalorder %s1156_s25, %s871_s15 }
  0x30   : > { %p868_p5 = pnand %p866_p3, %p1165_p4  ;;  %p874_p8 = scmp.lt.s32.totalorder %s872_s26, %s865_s13 }
  0x32   : > { %p869_p11 = pneg %p868_p5  ;;  %p875_p7 = por %p874_p8, %p873_p9 }
  0x34   : > { %p876_p10 = pnand %p875_p7, %p869_p11 }
  0x36   : > { %879 = shalt.err (!%p876_p10)
}
  0x37   : > { %788 = dma.hbm_to_vmem [thread:$0]  (!%p1143_p0), %s1152_s16, 64, %s1156_s25, %s1159_s27  }
  0x38   : > { %p1375_p12 = scmp.lt.s32.totalorder %s1026_s23, 3  ;;  %p1376_p1 = scmp.ge.s32.totalorder %s1026_s23, 1 }
  0x39   : > { %s1201_s13 = scalar_lea.hbm %s1347_s0, %s1139_s11  ;;  %s218_s14 = scalar_lea.vmem [#allocation2], %s1136_s10 }
  0x3a   : > { %p1193_p2 = pnand %p1376_p1, %p1375_p12  ;;  %s226_s15 = sshll.u32 %s218_s14, 4  ;;  %s1204_s15 = int_to_ptr.vmem [resolvable:$true] %s226_s15 }
  0x3b   : > { %s1210_s26 = scalar_lea.hbm %s1349_s2, %s1139_s11  ;;  %s1378_s1 = sand.u32 1, %s1014_s20  }
  0x3c   : > { %s1377_s9 = scalar_select %p1193_p2, 1, 0 }
  0x3d   : > { %s215_s22 = scalar_lea.sflag [#allocation3], %s1378_s1  ;;  %s880_s7 = scalar_lea.hbm %s1201_s13, 64 }
  0x3e   : > { %p881_p8 = scmp.ne.s32.totalorder %s1201_s13, %s880_s7  ;;  %s885_s23 = scalar_lea.hbm %s1347_s0, 128 }
  0x3f   : > { %p886_p6 = scmp.lt.u32.totalorder %s1201_s13, %s1347_s0  ;;  %p887_p13 = scmp.lt.u32.totalorder %s885_s23, %s880_s7 }
  0x40   : > { %p883_p9 = pnand %p881_p8, %p1165_p4  ;;  %p889_p5 = scmp.lt.u32.totalorder %s880_s7, %s1201_s13 }
  0x41   : > { %p888_p3 = por %p887_p13, %p886_p6 }
  0x42   : > { %p884_p11 = pneg %p883_p9 }
  0x43   : > { %p890_p7 = por %p889_p5, %p888_p3 }
  0x45   : > { %p891_p10 = pnand %p890_p7, %p884_p11 }
  0x47   : > { %894 = shalt.err (!%p891_p10)
}
  0x48   : > { %s895_s1 = scalar_lea.vmem %s1204_s15, 64  ;;  %s1029_s11 = smov [#allocation2]  }
  0x49   : > { %p896_p12 = scmp.ne.s32.totalorder %s1204_s15, %s895_s1  ;;  %s900_s16 = sshll.u32 %s1029_s11, 4  ;;  %s901_s16 = int_to_ptr.vmem [resolvable:$false] %s900_s16 }
  0x4a   : > { %s902_s8 = scalar_lea.vmem %s901_s16, 128  ;;  %p903_p9 = scmp.lt.s32.totalorder %s1204_s15, %s901_s16 }
  0x4b   : > { %p898_p1 = pnand %p896_p12, %p1165_p4  ;;  %p904_p2 = scmp.lt.s32.totalorder %s902_s8, %s895_s1 }
  0x4d   : > { %p899_p8 = pneg %p898_p1  ;;  %p905_p6 = por %p904_p2, %p903_p9 }
  0x4f   : > { %p906_p13 = pnand %p905_p6, %p899_p8 }
  0x51   : > { %909 = shalt.err (!%p906_p13)
}
  0x52   : > { %785 = dma.hbm_to_vmem [thread:$0]  (!%p1143_p0), %s1201_s13, 64, %s1204_s15, %s215_s22  }
  0x53   : > { %s256_s23 = scalar_lea.vmem [#allocation7], %s1136_s10  ;;  %s910_s25 = scalar_lea.hbm %s1210_s26, 64 }
  0x54   : > { %s264_s7 = sshll.u32 %s256_s23, 4  ;;  %p911_p11 = scmp.ne.s32.totalorder %s1210_s26, %s910_s25  ;;  %s265_s7 = int_to_ptr.vmem [resolvable:$true] %s264_s7 }
  0x55   : > { %s915_s14 = scalar_lea.hbm %s1349_s2, 128  ;;  %p916_p5 = scmp.lt.u32.totalorder %s1210_s26, %s1349_s2 }
  0x56   : > { %p913_p2 = pnand %p911_p11, %p1165_p4  ;;  %p917_p7 = scmp.lt.u32.totalorder %s915_s14, %s910_s25 }
  0x57   : > { %p919_p12 = scmp.lt.u32.totalorder %s910_s25, %s1210_s26 }
  0x58   : > { %p914_p3 = pneg %p913_p2  ;;  %p918_p10 = por %p917_p7, %p916_p5 }
  0x5a   : > { %p920_p1 = por %p919_p12, %p918_p10 }
  0x5c   : > { %p921_p8 = pnand %p920_p1, %p914_p3 }
  0x5e   : > { %924 = shalt.err (!%p921_p8)
}
  0x5f   : > { %s925_s22 = scalar_lea.vmem %s265_s7, 64  ;;  %s1030_s10 = smov [#allocation7]  }
  0x60   : > { %p926_p9 = scmp.ne.s32.totalorder %s265_s7, %s925_s22  ;;  %s930_s13 = sshll.u32 %s1030_s10, 4  ;;  %s931_s13 = int_to_ptr.vmem [resolvable:$false] %s930_s13 }
  0x61   : > { %s932_s15 = scalar_lea.vmem %s931_s13, 128  ;;  %p933_p11 = scmp.lt.s32.totalorder %s265_s7, %s931_s13 }
  0x62   : > { %p928_p6 = pnand %p926_p9, %p1165_p4  ;;  %p934_p2 = scmp.lt.s32.totalorder %s932_s15, %s925_s22 }
  0x64   : > { %p929_p13 = pneg %p928_p6  ;;  %p935_p0 = por %p934_p2, %p933_p11 }
  0x66   : > { %p936_p5 = pnand %p935_p0, %p929_p13 }
  0x68   : > { %939 = shalt.err (!%p936_p5)
}
  0x69   : > { %p1379_p7 = scmp.ne.s32.totalorder %s1372_s12, 0  ;;  %p1380_p3 = scmp.ne.s32.totalorder %s1377_s9, 0 }
  0x6a   : > { %s1257_s29 = sand.u32 (!%p1380_p3), 1, %s1010_s19   ;;  %p1381_p0 = scmp.ne.s32.totalorder (!%p1380_p3), %s1367_s30, 0 }
  0x6b   : > { %791 = dma.hbm_to_vmem [thread:$0]  (!%p1379_p7), %s1210_s26, 64, %s265_s7, %s1159_s27  }
  0x6c   : > { %273 = sbr.rel (%p1380_p3) target bundleno = 359 (0x167), region = 40  ;;  %s1260_s16 = sshll.u32 (!%p1380_p3), %s1257_s29, 2 }
  0x6d   : > { %s276_s8 = scalar_lea.sflag (!%p1380_p3), [#allocation3], %s1257_s29  ;;  %s279_s23 = scalar_lea.vmem (!%p1380_p3), [#allocation2], %s1260_s16 }
  0x73   : > { %993 = dma.done.wait (%p1381_p0), %s276_s8, 64  }
  0x74   : > { %995 = vsyncadd (%p1381_p0), %s276_s8, 4294967232  ;;  %s284_s12 = sand.u32 1, %s1096_s24   ;;  %s288_s9 = scalar_lea.vmem [#allocation5], %s1260_s16 }
  0x75   : > { %s285_s27 = scalar_lea.sflag [#allocation6], %s284_s12 }
  0x76   : > { %997 = dma.done.wait (%p1381_p0), %s285_s27, 128  }
  0x77   : > { %999 = vsyncadd (%p1381_p0), %s285_s27, 4294967168  ;;  %v1031_v0 = vmov 0.0   ;;  %vm1032_vm0 = vmmov 0   ;;  %v1033_v1 = vmov 0   ;;  %vm346_vm1 = vcmask 1043456   ;;  %s297_s30 = scalar_lea.vmem [#allocation7], %s1260_s16 }
  0x78   : > { %760 = vmatprep.subr.mxu0 %v1031_v0  ;;  %762 = vmatprep.mubr.msk.f32.mxu0 %vm1032_vm0, %v1031_v0  ;;  %vm342_vm2 = vcmask 31744   ;;  %v422_v2 = vld [vmem:[%s288_s9] sm:$0xf]  ;;  %v739_v3 = vld [vmem:[%s1350_s3 + $0x4] sm:$0xf]  ;;  %s746_s11 = sshll.u32 %s1018_s21, 6 }
  0x79   : > { %755 = vmatprep.subr.mxu1 %v1031_v0  ;;  %757 = vmatprep.mubr.msk.f32.mxu1 %vm1032_vm0, %v1031_v0  ;;  %v502_v4 = vld [vmem:[%s297_s30] sm:$0xf]  ;;  %v335_v5 = vld [vmem:[%s279_s23] sm:$0xf]  ;;  %v742_v8 = vld [vmem:[%s1350_s3 + $0x8] sm:$0xf]  ;;  %s1298_s8 = scalar_lea.hbm %s1352_s5, %s746_s11 }
  0x7a   : > { %849 = vset.pattern.permute.xlu0 %v1033_v1  ;;  %761 = vmatpush3.msk.msra.mxu0 %vm346_vm1, %v422_v2  ;;  %v334_v6 = vld [vmem:[%s1350_s3] sm:$0xf]  ;;  %s333_s22 = scalar_lea.vmem [#allocation8], %s1260_s16  ;;  %vm580_vm3 = vcmask 60416   ;;  %s583_s23 = scalar_lea.sflag [#allocation4], %s1257_s29 }
  0x7b   : > { %763 = vmatmul.mubr.msk.f32.vlgmr.msra.gmra.mrb[0].mxu0 %vm342_vm2, %v739_v3  ;;  %765 = vmatprep.subr.mxu0 %v1031_v0  ;;  %v336_v7 = vld [vmem:[%s1351_s4] sm:$0xf]  ;;  %s597_s10 = sshll.u32 %s333_s22, 4  ;;  %p1382_p10 = scmp.ne.s32.totalorder %s1368_s6, 0  ;;  %s1300_s10 = int_to_ptr.vmem [resolvable:$true] %s597_s10 }
  0x7c   : > { %766 = vmatpush3.msk.msra.mxu0 %vm346_vm1, %v502_v4  ;;  %756 = vmatpush3.msk.msra.mxu1 %vm346_vm1, %v335_v5  ;;  %s940_s12 = scalar_lea.vmem %s1300_s10, 64  ;;  %s1034_s21 = smov [#allocation8]  }
  0x7d   : > { %758 = vmatmul.mubr.msk.f32.vlgmr.msra.gmra.mrb[0].mxu1 %vm342_vm2, %v334_v6  ;;  %767 = vmatprep.mubr.msk.f32.mxu0 %vm1032_vm0, %v1031_v0  ;;  %p941_p4 = scmp.ne.s32.totalorder %s1300_s10, %s940_s12  ;;  %s944_s16 = sshll.u32 %s1034_s21, 4  ;;  %s945_s16 = int_to_ptr.vmem [resolvable:$false] %s944_s16 }
  0x7e   : > { %339 = vperm.xlu0 %849, %v336_v7   ;;  %s946_s27 = scalar_lea.vmem %s945_s16, 128  ;;  %p947_p8 = scmp.lt.s32.totalorder %s1300_s10, %s945_s16 }
  0x7f   : > { %p942_p12 = pnand %p941_p4, %p1382_p10  ;;  %p948_p9 = scmp.lt.s32.totalorder %s946_s27, %s940_s12 }
  0x81   : > { %p943_p1 = pneg %p942_p12  ;;  %p949_p6 = por %p948_p9, %p947_p8 }
  0x83   : > { %768 = vmatmul.mubr.msk.f32.vlgmr.msra.gmra.mrb[0].mxu0 %vm342_vm2, %v742_v8  ;;  %p950_p13 = pnand %p949_p6, %p943_p1 }
  0xfd   : > { %v340_v9 = vpop.permute.xlu0 %339 }
 0x150   : > { %v416_v10 = vpop.f32.mrb[0].mxu1 }
 0x151   : > { %v759_v11 = vpop.f32.mrb[1].mxu1  ;;  %v417_v12 = vadd.f32 %v416_v10, %v340_v9 }
 0x156   : > { %v575_v13 = vpop.f32.mrb[0].mxu0 }
 0x157   : > { %v771_v14 = vadd.f32 %v575_v13, %v417_v12  ;;  %v769_v15 = vpop.f32.mrb[1].mxu0 }
 0x159   : > { %581 = vst.msk [vmem:[%s333_s22] sm:$0xf] %vm580_vm3, %v771_v14 }
 0x15a   : > { %953 = shalt.err (!%p950_p13)
}
 0x15b   : > { %s954_s29 = scalar_lea.hbm %s1298_s8, 64  ;;  %s958_s26 = scalar_lea.hbm %s1352_s5, 128 }
 0x15c   : > { %p955_p11 = scmp.ne.s32.totalorder %s1298_s8, %s954_s29  ;;  %p959_p7 = scmp.lt.u32.totalorder %s1298_s8, %s1352_s5 }
 0x15d   : > { %p960_p3 = scmp.lt.u32.totalorder %s958_s26, %s954_s29  ;;  %p962_p4 = scmp.lt.u32.totalorder %s954_s29, %s1298_s8 }
 0x15e   : > { %p956_p2 = pnand %p955_p11, %p1382_p10 }
 0x15f   : > { %p961_p0 = por %p960_p3, %p959_p7 }
 0x160   : > { %p957_p5 = pneg %p956_p2 }
 0x161   : > { %p963_p12 = por %p962_p4, %p961_p0 }
 0x163   : > { %p964_p1 = pnand %p963_p12, %p957_p5 }
 0x165   : > { %967 = shalt.err (!%p964_p1)
}
 0x166   : > { %780 = dma.vmem_to_hbm [thread:$0]  (%p1382_p10), %s1300_s10, 64, %s1298_s8, %s583_s23  }
 0x167 PF: > { %s1383_s25 = sld [smem:[#allocation16_spill]]  ;;  %s1384_s28 = sld [smem:[#allocation13_spill]] }
 0x168   : > { %s609_s17 = sand.u32 1, %s1006_s18  }
 0x169   : > { %s610_s14 = scalar_lea.sflag [#allocation4], %s609_s17 }
 0x16d   : > { %p1385_p8 = scmp.ne.s32.totalorder %s1383_s25, 0  ;;  %p1386_p9 = scmp.ge.s32.totalorder %s1384_s28, 2 }
 0x16f   : > { %p793_p6 = pnand %p1386_p9, %p1385_p8 }
 0x171   : > { %1001 = dma.done.wait (!%p793_p6), %s610_s14, 64  }
 0x172   : > { %1003 = vsyncadd (!%p793_p6), %s610_s14, 4294967232  ;;  %s24_s23 = sadd.s32 1, %s1384_s28   ;;  %s1387_s6 = sld [smem:[#allocation15_spill]] }
 0x173   : > { %p21_p13 = scmp.ge.s32.totalorder %s24_s23, 4   ;;  %s1388_s21 = sld [smem:[#allocation12_spill]] }
 0x174   : > { %s1389_s22 = sld [smem:[#allocation14_spill]]  ;;  %s1390_s18 = smov %s1010_s19 }
 0x175   : > { %s1391_s19 = smov %s1014_s20  ;;  %23 = sbr.rel (!%p21_p13) target bundleno = 10 (0xa), region = 111 }
 0x178   : > { %s1392_s20 = smov %s1387_s6 }
 0x17c   :  { %615 = vsyncpa [#allocation3], 1 }
 0x17d   :  { %617 = vsyncpa [#allocation3 + $0x1], 1 }
 0x17e   :  { %618 = vsyncpa [#allocation6], 1 }
 0x17f   :  { %620 = vsyncpa [#allocation6 + $0x1], 1 }
 0x180   :  { %621 = vsyncpa [#allocation4], 1 }
 0x181   :  { %623 = vsyncpa [#allocation4 + $0x1], 1 }

</bundles_post_ra>
